<compile_context>
chip_gen: v5e
topology: v5e:2x2
jax: 0.10.0
libtpu: 0.0.40
codegen_flags: <defaults>
</compile_context>

<pallas_src>
import functools

import jax
import jax.numpy as jnp
from jax.experimental import pallas as pl
from jax.experimental.pallas import tpu as pltpu


def _bce_kernel(logits_ref, targets_ref, out_ref, acc_ref, *,
                tb, inner, n_rows, need_mask):
    s = pl.program_id(0)   # shard index (parallel axis)
    i = pl.program_id(1)   # row-block within shard (reduction axis)

    @pl.when(i == 0)
    def _init():
        acc_ref[...] = jnp.zeros_like(acc_ref)

    x = logits_ref[...].astype(jnp.float32)
    t = targets_ref[...].astype(jnp.float32)
    # Numerically stable BCE-with-logits, identical to PyTorch:
    #   loss = max(x, 0) - x * t + log(1 + exp(-|x|))
    per_elem = jnp.maximum(x, 0.0) - x * t + jnp.log1p(jnp.exp(-jnp.abs(x)))

    rows_blk, cols = per_elem.shape            # (tb, C), static

    def _fold_and_accumulate(v):
        # Layout-preserving reshapes: rows split as (vreg-group, 8 sublanes),
        # cols split as (vreg-group, 128 lanes) when possible.  The sums over
        # the group axes are inter-vreg VPU adds only (no XLU work here).
        if cols % 128 == 0:
            folded = v.reshape(rows_blk // 8, 8, cols // 128, 128).sum(axis=(0, 2))
        else:
            folded = v.reshape(rows_blk // 8, 8, cols).sum(axis=0)
        acc_ref[...] += folded

    if need_mask:
        row0 = (s * inner + i) * tb
        block_has_pad = row0 + tb > n_rows     # scalar: only tail blocks pay

        @pl.when(jnp.logical_not(block_has_pad))
        def _plain():
            _fold_and_accumulate(per_elem)

        @pl.when(block_has_pad)
        def _masked():
            rows = row0 + jax.lax.broadcasted_iota(jnp.int32, per_elem.shape, 0)
            _fold_and_accumulate(jnp.where(rows < n_rows, per_elem, 0.0))
    else:
        _fold_and_accumulate(per_elem)

    @pl.when(i == inner - 1)
    def _finalize():
        total = jnp.sum(acc_ref[...])          # single tiny XLU collapse / shard
        out_ref[...] = jnp.full(out_ref.shape, total, dtype=jnp.float32)


def _tpu_budget():
    """(physical VMEM bytes, TensorCores per chip) with safe fallbacks."""
    vmem_bytes = 128 * 1024 * 1024
    num_cores = 1
    try:
        info = pltpu.get_tpu_info()
        v = getattr(info, "vmem_capacity_bytes", None)
        if v:
            vmem_bytes = int(v)
        for name in ("num_cores", "tensorcores_per_chip", "num_tensorcores",
                     "cores_per_chip"):
            c = getattr(info, name, None)
            if c:
                num_cores = int(c)
                break
    except Exception:
        pass
    return vmem_bytes, num_cores


def classification_loss(logits, targets, *, tb=None, num_shards=None,
                        binary_targets=False):
    """Equivalent of ClassificationLoss.forward: mean BCE-with-logits over (B, C)."""
    assert logits.shape == targets.shape and logits.ndim == 2
    B, C = logits.shape

    if (binary_targets and jnp.issubdtype(targets.dtype, jnp.floating)
            and jnp.dtype(targets.dtype).itemsize > 2):
        # Exact for hard 0/1 labels; halves the targets HBM stream.
        targets = targets.astype(jnp.bfloat16)

    vmem_bytes, num_cores = _tpu_budget()
    if num_shards is None:
        num_shards = max(1, num_cores)

    itemsize_l = jnp.dtype(logits.dtype).itemsize
    itemsize_t = jnp.dtype(targets.dtype).itemsize
    bytes_per_row = max(1, C * (itemsize_l + itemsize_t))

    # Per-step tile-pair budget: big enough to amortize the ~0.35 us/step
    # pipeline overhead, small enough that the double-buffered pairs fit the
    # per-generation VMEM (64 MiB/TC on v7x, 128 MiB on v5e/v6e).
    pair_budget = (10 << 20) if vmem_bytes <= (64 << 20) else (16 << 20)

    if tb is None:
        tb = pair_budget // bytes_per_row
        tb = max(8, min(4096, (tb // 8) * 8))
    else:
        tb = max(8, (int(tb) // 8) * 8)
    b_ceil8 = -(-B // 8) * 8
    tb = min(tb, b_ceil8)

    n_blocks = -(-B // tb)
    ns = max(1, min(num_shards, n_blocks))          # shards for the parallel axis
    inner = -(-n_blocks // ns)                      # row blocks per shard
    b_pad = ns * inner * tb
    if b_pad != B:
        logits = jnp.pad(logits, ((0, b_pad - B), (0, 0)))
        targets = jnp.pad(targets, ((0, b_pad - B), (0, 0)))

    acc_lanes = 128 if C % 128 == 0 else C

    # Explicit VMEM budget: 2 inputs x 2 pipeline buffers + tiny accumulator/output.
    tile_pair_bytes = tb * C * (itemsize_l + itemsize_t)
    need = 2 * tile_pair_bytes + 8 * acc_lanes * 4 + 2 * 8 * 128 * 4
    vmem_limit = max(32 << 20, need + (8 << 20))
    vmem_limit = int(min(vmem_limit, (vmem_bytes * 7) // 8))

    kernel = functools.partial(_bce_kernel, tb=tb, inner=inner, n_rows=B,
                               need_mask=(b_pad != B))

    partials = pl.pallas_call(
        kernel,
        out_shape=jax.ShapeDtypeStruct((ns * 8, 128), jnp.float32),
        grid_spec=pltpu.PrefetchScalarGridSpec(
            num_scalar_prefetch=0,
            grid=(ns, inner),
            in_specs=[
                pl.BlockSpec((tb, C), lambda s, i: (s * inner + i, 0)),
                pl.BlockSpec((tb, C), lambda s, i: (s * inner + i, 0)),
            ],
            out_specs=pl.BlockSpec((8, 128), lambda s, i: (s, 0)),
            scratch_shapes=[pltpu.VMEM((8, acc_lanes), jnp.float32)],
        ),
        compiler_params=pltpu.CompilerParams(
            dimension_semantics=("parallel", "arbitrary"),
            vmem_limit_bytes=vmem_limit,
        ),
    )(logits, targets)

    # Each shard's (8, 128) block holds its partial sum broadcast everywhere;
    # finish the global sum + mean in JAX (tiny).
    shard_sums = partials[::8, 0]
    return jnp.sum(shard_sums) * (1.0 / (B * C))


def _ref_bce(logits, targets):
    x = logits.astype(jnp.float32)
    t = targets.astype(jnp.float32)
    return jnp.mean(jnp.maximum(x, 0.0) - x * t + jnp.log1p(jnp.exp(-jnp.abs(x))))


if __name__ == "__main__":
    key = jax.random.PRNGKey(0)
    k1, k2, k3, k4 = jax.random.split(key, 4)

    # Case 1: bf16 logits, hard 0/1 targets (wrapper casts to bf16 — exact).
    # tb=16 / num_shards=2 force a (2, 2) grid with a padded + masked final
    # block: exercises pipelining, sharding, masking and the (8,128) accumulator.
    B1, C1 = 60, 256
    logits1 = jax.random.normal(k1, (B1, C1), dtype=jnp.float32).astype(jnp.bfloat16)
    targets1 = (jax.random.uniform(k2, (B1, C1)) > 0.5).astype(jnp.float32)
    loss1 = classification_loss(logits1, targets1, tb=16, num_shards=2,
                                binary_targets=True)
    jax.block_until_ready(loss1)
    ref1 = _ref_bce(logits1, targets1)
    assert jnp.allclose(loss1, ref1, rtol=1e-4, atol=1e-5), (loss1, ref1)

    # Case 2: f32 logits, soft f32 targets, C not a multiple of 128 and ragged B
    # (default tile/shard selection, (8, C) accumulator path, padded rows).
    B2, C2 = 33, 200
    logits2 = jax.random.normal(k3, (B2, C2), dtype=jnp.float32)
    targets2 = jax.random.uniform(k4, (B2, C2), dtype=jnp.float32)
    loss2 = classification_loss(logits2, targets2)
    jax.block_until_ready(loss2)
    ref2 = _ref_bce(logits2, targets2)
    assert jnp.allclose(loss2, ref2, rtol=1e-4, atol=1e-6), (loss2, ref2)

    print("KERNEL_OK")
</pallas_src>

<mosaic_0001>
module attributes {stable_mosaic.version = 11 : i64} {
  func.func @_bce_kernel(%arg0: i32, %arg1: i32, %arg2: memref<16x256xbf16, #tpu.memory_space<vmem>>, %arg3: memref<16x256xbf16, #tpu.memory_space<vmem>>, %arg4: memref<8x128xf32, #tpu.memory_space<vmem>>, %arg5: memref<8x128xf32, #tpu.memory_space<vmem>>) attributes {dimension_semantics = [#tpu.dimension_semantics<parallel>, #tpu.dimension_semantics<arbitrary>], iteration_bounds = array<i64: 2, 2>, scalar_prefetch = 0 : i64, scratch_operands = 1 : i64, tpu.core_type = #tpu.core_type<tc>, window_params = [{transform_indices = @transform_0, window_bounds = array<i64: 16, 256>}, {transform_indices = @transform_1, window_bounds = array<i64: 16, 256>}, {transform_indices = @transform_2, window_bounds = array<i64: 8, 128>}]} {
    %c0_i32 = arith.constant 0 : i32
    %0 = arith.cmpi eq, %arg1, %c0_i32 : i32
    %1 = arith.extui %0 : i1 to i32
    %c0_i32_0 = arith.constant 0 : i32
    %2 = arith.cmpi ne, %1, %c0_i32_0 : i32
    scf.if %2 {
      %cst_9 = arith.constant 0.000000e+00 : f32
      %30 = vector.broadcast %cst_9 : f32 to vector<8x128xf32>
      %c0_10 = arith.constant 0 : index
      %c0_11 = arith.constant 0 : index
      %31 = vector.load %arg5[%c0_10, %c0_11] : memref<8x128xf32, #tpu.memory_space<vmem>>, vector<8x128xf32>
      tpu.vector_store %arg5[%c0_10, %c0_11], %30 {strides = array<i32>} : memref<8x128xf32, #tpu.memory_space<vmem>>, vector<8x128xf32>,
    } else {
    }
    %c0 = arith.constant 0 : index
    %c0_1 = arith.constant 0 : index
    %3 = vector.load %arg2[%c0, %c0_1] : memref<16x256xbf16, #tpu.memory_space<vmem>>, vector<16x256xbf16>
    %4 = arith.extf %3 : vector<16x256xbf16> to vector<16x256xf32>
    %c0_2 = arith.constant 0 : index
    %c0_3 = arith.constant 0 : index
    %5 = vector.load %arg3[%c0_2, %c0_3] : memref<16x256xbf16, #tpu.memory_space<vmem>>, vector<16x256xbf16>
    %6 = arith.extf %5 : vector<16x256xbf16> to vector<16x256xf32>
    %cst = arith.constant 0.000000e+00 : f32
    %7 = vector.broadcast %cst : f32 to vector<16x256xf32>
    %8 = arith.maximumf %4, %7 : vector<16x256xf32>
    %9 = arith.mulf %4, %6 : vector<16x256xf32>
    %10 = arith.subf %8, %9 : vector<16x256xf32>
    %11 = math.absf %4 : vector<16x256xf32>
    %cst_4 = arith.constant 0.000000e+00 : f32
    %12 = vector.broadcast %cst_4 : f32 to vector<16x256xf32>
    %13 = arith.subf %12, %11 : vector<16x256xf32>
    %14 = math.exp %13 : vector<16x256xf32>
    %15 = math.log1p %14 : vector<16x256xf32>
    %16 = arith.addf %10, %15 : vector<16x256xf32>
    %c2_i32 = arith.constant 2 : i32
    %17 = arith.muli %arg0, %c2_i32 : i32
    %18 = arith.addi %17, %arg1 : i32
    %c16_i32 = arith.constant 16 : i32
    %19 = arith.muli %18, %c16_i32 : i32
    %c16_i32_5 = arith.constant 16 : i32
    %20 = arith.addi %19, %c16_i32_5 : i32
    %c60_i32 = arith.constant 60 : i32
    %21 = arith.cmpi sgt, %20, %c60_i32 : i32
    %true = arith.constant true
    %22 = arith.xori %21, %true : i1
    %23 = arith.extui %22 : i1 to i32
    %c0_i32_6 = arith.constant 0 : i32
    %24 = arith.cmpi ne, %23, %c0_i32_6 : i32
    scf.if %24 {
      %30 = vector.shape_cast %16 : vector<16x256xf32> to vector<2x8x2x128xf32>
      %cst_9 = arith.constant dense<0.000000e+00> : vector<8x128xf32>
      %31 = vector.multi_reduction <add>, %30, %cst_9 [0, 2] : vector<2x8x2x128xf32> to vector<8x128xf32>
      %c0_10 = arith.constant 0 : index
      %c0_11 = arith.constant 0 : index
      %32 = vector.load %arg5[%c0_10, %c0_11] : memref<8x128xf32, #tpu.memory_space<vmem>>, vector<8x128xf32>
      %33 = arith.addf %32, %31 : vector<8x128xf32>
      %c0_12 = arith.constant 0 : index
      %c0_13 = arith.constant 0 : index
      %34 = vector.load %arg5[%c0_12, %c0_13] : memref<8x128xf32, #tpu.memory_space<vmem>>, vector<8x128xf32>
      tpu.vector_store %arg5[%c0_12, %c0_13], %33 {strides = array<i32>} : memref<8x128xf32, #tpu.memory_space<vmem>>, vector<8x128xf32>,
    } else {
    }
    %25 = arith.extui %21 : i1 to i32
    %c0_i32_7 = arith.constant 0 : i32
    %26 = arith.cmpi ne, %25, %c0_i32_7 : i32
    scf.if %26 {
      %30 = tpu.iota {dimensions = array<i32: 0>} : vector<16x256xi32>
      %31 = vector.broadcast %19 : i32 to vector<16x256xi32>
      %32 = arith.addi %31, %30 : vector<16x256xi32>
      %c60_i32_9 = arith.constant 60 : i32
      %33 = vector.broadcast %c60_i32_9 : i32 to vector<16x256xi32>
      %34 = arith.cmpi slt, %32, %33 : vector<16x256xi32>
      %cst_10 = arith.constant 0.000000e+00 : f32
      %35 = vector.broadcast %cst_10 : f32 to vector<16x256xf32>
      %36 = arith.select %34, %16, %35 : vector<16x256xi1>, vector<16x256xf32>
      %37 = vector.shape_cast %36 : vector<16x256xf32> to vector<2x8x2x128xf32>
      %cst_11 = arith.constant dense<0.000000e+00> : vector<8x128xf32>
      %38 = vector.multi_reduction <add>, %37, %cst_11 [0, 2] : vector<2x8x2x128xf32> to vector<8x128xf32>
      %c0_12 = arith.constant 0 : index
      %c0_13 = arith.constant 0 : index
      %39 = vector.load %arg5[%c0_12, %c0_13] : memref<8x128xf32, #tpu.memory_space<vmem>>, vector<8x128xf32>
      %40 = arith.addf %39, %38 : vector<8x128xf32>
      %c0_14 = arith.constant 0 : index
      %c0_15 = arith.constant 0 : index
      %41 = vector.load %arg5[%c0_14, %c0_15] : memref<8x128xf32, #tpu.memory_space<vmem>>, vector<8x128xf32>
      tpu.vector_store %arg5[%c0_14, %c0_15], %40 {strides = array<i32>} : memref<8x128xf32, #tpu.memory_space<vmem>>, vector<8x128xf32>,
    } else {
    }
    %c1_i32 = arith.constant 1 : i32
    %27 = arith.cmpi eq, %arg1, %c1_i32 : i32
    %28 = arith.extui %27 : i1 to i32
    %c0_i32_8 = arith.constant 0 : i32
    %29 = arith.cmpi ne, %28, %c0_i32_8 : i32
    scf.if %29 {
      %c0_9 = arith.constant 0 : index
      %c0_10 = arith.constant 0 : index
      %30 = vector.load %arg5[%c0_9, %c0_10] : memref<8x128xf32, #tpu.memory_space<vmem>>, vector<8x128xf32>
      %31 = vector.shape_cast %30 : vector<8x128xf32> to vector<1x8x128xf32>
      %cst_11 = arith.constant dense<0.000000e+00> : vector<1xf32>
      %32 = vector.multi_reduction <add>, %31, %cst_11 [1, 2] : vector<1x8x128xf32> to vector<1xf32>
      %33 = vector.shape_cast %32 : vector<1xf32> to vector<1x1x1xf32>
      %34 = vector.extract %33[0, 0, 0] : f32 from vector<1x1x1xf32>
      %35 = vector.broadcast %34 : f32 to vector<8x128xf32>
      %c0_12 = arith.constant 0 : index
      %c0_13 = arith.constant 0 : index
      %36 = vector.load %arg4[%c0_12, %c0_13] : memref<8x128xf32, #tpu.memory_space<vmem>>, vector<8x128xf32>
      tpu.vector_store %arg4[%c0_12, %c0_13], %35 {strides = array<i32>} : memref<8x128xf32, #tpu.memory_space<vmem>>, vector<8x128xf32>,
    } else {
    }
    return
  }
  func.func @transform_0(%arg0: i32, %arg1: i32) -> (i32, i32) {
    %c2_i32 = arith.constant 2 : i32
    %0 = arith.muli %arg0, %c2_i32 : i32
    %1 = arith.addi %0, %arg1 : i32
    %c0_i32 = arith.constant 0 : i32
    %c0_i32_0 = arith.constant 0 : i32
    return %1, %c0_i32 : i32, i32
  }
  func.func @transform_1(%arg0: i32, %arg1: i32) -> (i32, i32) {
    %c2_i32 = arith.constant 2 : i32
    %0 = arith.muli %arg0, %c2_i32 : i32
    %1 = arith.addi %0, %arg1 : i32
    %c0_i32 = arith.constant 0 : i32
    %c0_i32_0 = arith.constant 0 : i32
    return %1, %c0_i32 : i32, i32
  }
  func.func @transform_2(%arg0: i32, %arg1: i32) -> (i32, i32) {
    %c0_i32 = arith.constant 0 : i32
    %c0_i32_0 = arith.constant 0 : i32
    return %arg0, %c0_i32 : i32, i32
  }
}

</mosaic_0001>

<bundles_post_ra>
// kernel: tpu_custom_call.1
= control target key start
LH: loop header
LB: loop body
LE: loop exit
PB: predicated region body
PF: predicated region fallthrough
CT: control target
= control target key end

     0   :  { %s1621_s0 = inlined_call_operand.hbm [shape: bf16[64,256], index: 0, kind: input, shape index: {}]   ;;  %s1622_s1 = inlined_call_operand.hbm [shape: bf16[64,256], index: 1, kind: input, shape index: {}]   ;;  %s1623_s2 = inlined_call_operand.hbm [shape: f32[16,128], index: 2, kind: output, shape index: {}]  }
   0x1   :  { %1629 = sst [smem:[#allocation19_spill]] %s1621_s0 }
   0x2   :  { %7 = vsyncpa [#allocation4], 0 }
   0x3   :  { %9 = vsyncpa [#allocation4 + $0x1], 0 }
   0x4   :  { %10 = vsyncpa [#allocation7], 0 }
   0x5   :  { %12 = vsyncpa [#allocation7 + $0x1], 0 }
   0x6   :  { %13 = vsyncpa [#allocation5], 0 }
   0x7   :  { %15 = vsyncpa [#allocation5 + $0x1], 0  ;;  %s1273_s9 = smov 0   ;;  %s1275_s10 = smov 0  }
   0x8   :  { %s1277_s11 = smov 0   ;;  %s1279_s12 = smov 0  }
   0x9   :  { %s1281_s13 = smov 0   ;;  %s1283_s14 = smov 0  }
   0xa   :  { %s1285_s15 = smov 0   ;;  %s1287_s16 = smov 0  }
   0xb   :  { %s1289_s17 = smov 0   ;;  %s1291_s18 = smov 0  }
   0xc   :  { %s1293_s19 = smov 0  }
   0xd LB: > { %1630 = sst [smem:[#allocation12_spill]] %s1229_s14  ;;  %s895_s20 = sadd.s32 4294967295, %s1249_s19   ;;  %s1249_s19 = sphi %s1293_s19, %s21_s19   ;;  %s1245_s18 = sphi %s1291_s18, %s1659_s18   ;;  %s1241_s17 = sphi %s1289_s17, %s1652_s17   ;;  %s1237_s16 = sphi %s1287_s16, %s1651_s16   ;;  %s1233_s15 = sphi %s1285_s15, %s1650_s15   ;;  %s1229_s14 = sphi %s1283_s14, %s1649_s14   ;;  %s1225_s13 = sphi %s1281_s13, %s1658_s13   ;;  %s1221_s12 = sphi %s1279_s12, %s1657_s12   ;;  %s1217_s11 = sphi %s1277_s11, %s1656_s11   ;;  %s1213_s10 = sphi %s1275_s10, %s1655_s10   ;;  %s1209_s9 = sphi %s1273_s9, %s1654_s9  }
   0xe   : > { %1631 = sst [smem:[#allocation13_spill]] %s1241_s17  ;;  %s896_s21 = sadd.s32 4294967294, %s1249_s19  }
   0xf   : > { %1632 = sst [smem:[#allocation14_spill]] %s1245_s18  ;;  %s30_s22 = sadd.s32 1, %s1241_s17 }
  0x10   : > { %s33_s23 = sadd.s32 1, %s1245_s18  ;;  %p31_p0 = scmp.ge.s32.totalorder %s30_s22, 2 }
  0x11   : > { %s897_s24 = sshll.u32 %s1245_s18, 1  ;;  %s44_s26 = sadd.s32 1, %s1229_s14 }
  0x12   : > { %s1332_s25 = sadd.s32 %s1241_s17, %s897_s24  ;;  %s1661_s22 = smov (%p31_p0, %s30_s22), 0 }
  0x13   : > { %1633 = sst [smem:[#allocation15_spill]] %s1661_s22  ;;  %s1663_s23 = smov (!%p31_p0, %s33_s23), %s1245_s18 }
  0x14   : > { %p51_p1 = scmp.ne.s32.totalorder %s1229_s14, %s1225_s13  ;;  %p52_p2 = scmp.eq.s32.totalorder %s1249_s19, 0 }
  0x15   : > { %p35_p3 = scmp.ge.s32.totalorder %s1663_s23, 2  ;;  %p57_p4 = scmp.ne.s32.totalorder %s1225_s13, %s1221_s12 }
  0x16   : > { %p1342_p5 = por %p52_p2, %p51_p1  ;;  %p58_p6 = scmp.eq.s32.totalorder %s895_s20, 0 }
  0x17   : > { %s1665_s23 = smov (%p35_p3, %s1663_s23), 0  ;;  %s100_s29 = sadd.s32 1, %s1217_s11 }
  0x18   : > { %1635 = sst [smem:[#allocation16_spill]] %s1665_s23  ;;  %p1348_p7 = por %p58_p6, %p57_p4 }
  0x19   : > { %s898_s30 = sshll.u32 %s1665_s23, 1  ;;  %s97_s3 = ssub.s32 %s1245_s18, %s1665_s23 }
  0x1a   : > { %s40_s4 = sadd.s32 %s898_s30, %s1661_s22  ;;  %p98_p8 = scmp.eq.s32.totalorder %s97_s3, 0 }
  0x1b   : > { %s41_s5 = ssub.s32 %s1332_s25, %s40_s4  ;;  %p110_p9 = scmp.ne.s32.totalorder %s1217_s11, %s1213_s10 }
  0x1c   : > { %p42_p10 = scmp.eq.s32.totalorder %s41_s5, 0  ;;  %p111_p11 = scmp.eq.s32.totalorder %s895_s20, 3 }
  0x1d   : > { %s1361_s6 = scalar_select %p98_p8, %s1217_s11, %s100_s29  }
  0x1e   : > { %s1364_s7 = scalar_select %p42_p10, %s1229_s14, %s44_s26  }
  0x1f   : > { %1637 = sst [smem:[#allocation17_spill]] %s1361_s6  ;;  %p1366_p12 = por %p111_p11, %p110_p9 }
  0x20   : > { %1638 = sst [smem:[#allocation18_spill]] %s1364_s7  ;;  %p116_p13 = scmp.ne.s32.totalorder %s1213_s10, %s1209_s9 }
  0x21   : > { %p117_p0 = scmp.eq.s32.totalorder %s896_s21, 3  ;;  %p950_p1 = scmp.lt.s32.totalorder %s1249_s19, 4 }
  0x22   : > { %s1376_s12 = sand.u32 1, %s1229_s14   ;;  %s928_s26 = sshll.u32 %s1332_s25, 4 }
  0x23   : > { %p1378_p2 = por %p117_p0, %p116_p13  ;;  %s903_s24 = sshll.u32 %s1376_s12, 4 }
  0x24   : > { %s1641_s0 = sld [smem:[#allocation19_spill]]  ;;  %s141_s5 = scalar_lea.vmem [#allocation3], %s903_s24 }
  0x25   : > { %s152_s23 = sshll.u32 %s141_s5, 4  ;;  %p1389_p3 = pnand %p950_p1, %p1342_p5  ;;  %s153_s23 = int_to_ptr.vmem [resolvable:$true] %s152_s23 }
  0x26   : > { %p913_p4 = scmp.ge.s32.totalorder %s1249_s19, 1  ;;  %p185_p6 = scmp.lt.s32.totalorder %s1249_s19, 5 }
  0x27   : > { %s138_s25 = scalar_lea.sflag [#allocation4], %s1376_s12  ;;  %s1251_s22 = smov 128  }
  0x28   : > { %s1252_s18 = smov 8   ;;  %p186_p8 = pnand %p913_p4, %p185_p6 }
  0x29   : > { %s166_s27 = scalar_lea.vmem [#allocation6], %s903_s24  ;;  %s163_s17 = scalar_lea.sflag [#allocation7], %s1376_s12 }
  0x2a   : > { %s149_s3 = scalar_lea.hbm %s1641_s0, %s928_s26  ;;  %s177_s0 = sshll.u32 %s166_s27, 4  ;;  %s178_s0 = int_to_ptr.vmem [resolvable:$true] %s177_s0 }
  0x2b   : > { %s150_s4 = sshll.u32 %s149_s3, 4  ;;  %s174_s3 = scalar_lea.hbm %s1622_s1, %s928_s26  ;;  %s151_s4 = int_to_ptr.hbm [resolvable:$true] %s150_s4 }
  0x2c   : > { %942 = dma.hbm_to_vmem [thread:$0]  (!%p1389_p3), %s151_s4, 256, %s153_s23, %s138_s25, %s1251_s22, %s1251_s22, %s1252_s18  }
  0x2d   : > { %s175_s5 = sshll.u32 %s174_s3, 4  ;;  %189 = sbr.rel (%p186_p8) target bundleno = 403 (0x193), region = 28  ;;  %s176_s5 = int_to_ptr.hbm [resolvable:$true] %s175_s5 }
  0x2e   : > { %945 = dma.hbm_to_vmem [thread:$0]  (!%p1389_p3), %s176_s5, 256, %s178_s0, %s163_s17, %s1251_s22, %s1251_s22, %s1252_s18  }
  0x2f   : > { %s191_s7 = sand.u32 (!%p186_p8), 1, %s1225_s13  }
  0x30   : > { %s914_s14 = sshll.u32 (!%p186_p8), %s191_s7, 4  ;;  %s192_s6 = scalar_lea.sflag (!%p186_p8), [#allocation4], %s191_s7 }
  0x31   : > { %s195_s23 = scalar_lea.vmem (!%p186_p8), [#allocation3], %s914_s14 }
  0x32   : > { %1196 = dma.done.wait (%p1348_p7), %s192_s6, 256  }
  0x33   : > { %1198 = vsyncadd (%p1348_p7), %s192_s6, 4294967040  ;;  %s202_s24 = scalar_lea.sflag [#allocation7], %s191_s7  ;;  %s1409_s26 = scalar_lea.vmem [#allocation6], %s914_s14 }
  0x34   : > { %1200 = dma.done.wait (%p1348_p7), %s202_s24, 256  }
  0x35   : > { %1202 = vsyncadd (%p1348_p7), %s202_s24, 4294967040  ;;  %s229_s0 = sand.u32 1, %s1213_s10   ;;  %p917_p5 = scmp.ne.s32.totalorder %s1233_s15, 0 }
  0x36   : > { %s1418_s17 = sshll.u32 %s229_s0, 3 }
  0x37   : > { %s231_s18 = scalar_lea.vmem [#allocation8], %s1418_s17  ;;  %241 = sbr.rel (%p917_p5) target bundleno = 62 (0x3e), region = 40 }
  0x3c   : > { %v1253_v0 = vmov 0.0  }
  0x3d   : > { %242 = vst [vmem:[#allocation2] sm:$0xff] %v1253_v0 }
  0x3e PF: > { %v243_v1 = vld [vmem:[%s195_s23] sm:$0xff]  ;;  %v244_v2 = vld [vmem:[%s195_s23 + $0x8] sm:$0xff]  ;;  %s918_s14 = sshll.u32 %s1237_s16, 1 }
  0x3f   : > { %v1423_v3 = vunpack.c.l.bf16 %v243_v1  ;;  %v1425_v4 = vunpack.c.h.bf16 %v243_v1  ;;  %v1427_v5 = vunpack.c.l.bf16 %v244_v2  ;;  %s1430_s22 = sadd.s32 %s1233_s15, %s918_s14  ;;  %v1433_v6 = vunpack.c.h.bf16 %v244_v2  ;;  %v249_v19 = vld [vmem:[%s1409_s26] sm:$0xff]  ;;  %v250_v20 = vld [vmem:[%s1409_s26 + $0x8] sm:$0xff] }
  0x40   : > { %s919_s28 = sshll.u32 %s1430_s22, 4  ;;  %v251_v22 = vunpack.c.l.bf16 %v249_v19  ;;  %v252_v24 = vunpack.c.h.bf16 %v249_v19  ;;  %v253_v28 = vunpack.c.l.bf16 %v250_v20  ;;  %v254_v29 = vunpack.c.h.bf16 %v250_v20 }
  0x41   : > { %s1437_s6 = sadd.s32 16, %s919_s28  ;;  %v267_v7 = vand.u32 2147483647, %v1423_v3  ;;  %v268_v8 = vand.u32 2147483647, %v1425_v4  ;;  %v255_v33 = vmax.f32 %v1423_v3, 0.0 }
  0x42   : > { %v269_v9 = vand.u32 2147483647, %v1427_v5  ;;  %v270_v10 = vand.u32 2147483647, %v1433_v6  ;;  %v256_v34 = vmax.f32 %v1425_v4, 0.0  ;;  %v259_v36 = vmul.f32 %v251_v22, %v1423_v3  ;;  %p920_p7 = scmp.gt.s32.totalorder %s1437_s6, 60 }
  0x43   : > { %v271_v11 = vsub.f32 0.0, %v267_v7  ;;  %v272_v12 = vsub.f32 0.0, %v268_v8  ;;  %v260_v42 = vmul.f32 %v252_v24, %v1425_v4  ;;  %v257_v46 = vmax.f32 %v1427_v5, 0.0 }
  0x44   : > { %v273_v13 = vsub.f32 0.0, %v269_v9  ;;  %v274_v14 = vsub.f32 0.0, %v270_v10  ;;  %v261_v47 = vmul.f32 %v253_v28, %v1427_v5  ;;  %v258_v49 = vmax.f32 %v1433_v6, 0.0 }
  0x45   : > { %v275_v15 = vmul.f32 1.442695, %v271_v11  ;;  %v277_v16 = vmul.f32 1.442695, %v272_v12  ;;  %v262_v50 = vmul.f32 %v254_v29, %v1433_v6  ;;  %v263_v54 = vsub.f32 %v255_v33, %v259_v36 }
  0x46   : > { %v279_v17 = vmul.f32 1.442695, %v273_v13  ;;  %v281_v18 = vmul.f32 1.442695, %v274_v14  ;;  %v264_v59 = vsub.f32 %v256_v34, %v260_v42  ;;  %v265_v0 = vsub.f32 %v257_v46, %v261_v47 }
  0x47   : > { %1047 = vpow2.f32 %v275_v15  ;;  %v266_v6 = vsub.f32 %v258_v49, %v262_v50 }
  0x48   : > { %1049 = vpow2.f32 %v277_v16 }
  0x49   : > { %1051 = vpow2.f32 %v279_v17 }
  0x4a   : > { %1053 = vpow2.f32 %v281_v18 }
  0x4d   : > { %v1048_v21 = vpop.eup %1047 }
  0x4e   : > { %v1050_v23 = vpop.eup %1049  ;;  %v283_v25 = vadd.f32 1.0, %v1048_v21  ;;  %v286_v26 = vmul.f32 -0.5, %v1048_v21  ;;  %v289_v39 = vand.u32 2147483647, %v1048_v21 }
  0x4f   : > { %v1052_v27 = vpop.eup %1051  ;;  %v292_v30 = vadd.f32 1.0, %v1050_v23  ;;  %v295_v31 = vmul.f32 -0.5, %v1050_v23  ;;  %v298_v43 = vand.u32 2147483647, %v1050_v23 }
  0x50   : > { %v1054_v32 = vpop.eup %1053  ;;  %1055 = vlog2.f32 %v283_v25  ;;  %v301_v35 = vadd.f32 1.0, %v1052_v27  ;;  %v287_v37 = vadd.f32 1.0, %v286_v26  ;;  %v304_v38 = vmul.f32 -0.5, %v1052_v27 }
  0x51   : > { %1057 = vlog2.f32 %v292_v30  ;;  %v296_v40 = vadd.f32 1.0, %v295_v31  ;;  %v310_v41 = vadd.f32 1.0, %v1054_v32  ;;  %v313_v45 = vmul.f32 -0.5, %v1054_v32 }
  0x52   : > { %1059 = vlog2.f32 %v301_v35  ;;  %v305_v44 = vadd.f32 1.0, %v304_v38  ;;  %v307_v48 = vand.u32 2147483647, %v1052_v27  ;;  %v288_v51 = vmul.f32 %v1048_v21, %v287_v37 }
  0x53   : > { %1061 = vlog2.f32 %v310_v41  ;;  %v314_v52 = vadd.f32 1.0, %v313_v45  ;;  %vm1453_vm0 = vcmp.lt.f32.partialorder %v289_v39, 0.0004427343  ;;  %v297_v56 = vmul.f32 %v1050_v23, %v296_v40 }
  0x54   : > { %v316_v57 = vand.u32 2147483647, %v1054_v32  ;;  %vm1457_vm1 = vcmp.lt.f32.partialorder %v298_v43, 0.0004427343  ;;  %v306_v62 = vmul.f32 %v1052_v27, %v305_v44  ;;  %vm308_vm2 = vcmp.lt.f32.partialorder %v307_v48, 0.0004427343 }
  0x55   : > { %v315_v4 = vmul.f32 %v1054_v32, %v314_v52 }
  0x56   : > { %v1056_v53 = vpop.eup %1055  ;;  %vm317_vm3 = vcmp.lt.f32.partialorder %v316_v57, 0.0004427343 }
  0x57   : > { %v1058_v58 = vpop.eup %1057  ;;  %v285_v60 = vmul.f32 0.6931472, %v1056_v53 }
  0x58   : > { %v1060_v63 = vpop.eup %1059  ;;  %v294_v1 = vmul.f32 0.6931472, %v1058_v58 }
  0x59   : > { %v291_v2 = vsel %vm1453_vm0, %v288_v51, %v285_v60  ;;  %v303_v3 = vmul.f32 0.6931472, %v1060_v63  ;;  %v1062_v5 = vpop.eup %1061  ;;  %331 = sbr.rel (%p920_p7) target bundleno = 141 (0x8d), region = 44 }
  0x5a   : > { %v300_v7 = vsel %vm1457_vm1, %v297_v56, %v294_v1  ;;  %v1465_v8 = vadd.f32 %v291_v2, %v263_v54  ;;  %v312_v10 = vmul.f32 0.6931472, %v1062_v5 }
  0x5b   : > { %v309_v9 = vsel %vm308_vm2, %v306_v62, %v303_v3  ;;  %v1467_v11 = vadd.f32 %v300_v7, %v264_v59 }
  0x5c   : > { %v1469_v12 = vadd.f32 %v309_v9, %v265_v0  ;;  %v318_v13 = vsel %vm317_vm3, %v315_v4, %v312_v10 }
  0x5d   : > { %v1471_v14 = vadd.f32 %v318_v13, %v266_v6 }
  0x5e   : > { %v332_v15 = vrot.slane %v1465_v8, 4  ;;  %vm333_vm4 = vcmask 1047556   ;;  %v343_v16 = vrot.slane %v1467_v11, 4  ;;  %v1254_v17 = vmov 1983009808  }
  0x5f   : > { %v336_v18 = vunpack.c.l.s4 %v1254_v17  ;;  %v385_v19 = vrot.slane %v1469_v12, 4  ;;  %v395_v20 = vrot.slane %v1471_v14, 4  ;;  %v1255_v23 = vmov 1934713408  }
  0x60   : > { %v334_v21 = vsel %vm333_vm4, 0.0, %v332_v15  ;;  %v344_v22 = vsel %vm333_vm4, 0.0, %v343_v16  ;;  %v358_v24 = vunpack.c.l.s4 %v1255_v23  ;;  %vm437_vm5 = vcmask 1041408  }
  0x61   : > { %v337_v25 = vunpack.c.0.s8 %v336_v18  ;;  %v386_v26 = vsel %vm333_vm4, 0.0, %v385_v19  ;;  %v396_v27 = vsel %vm333_vm4, 0.0, %v395_v20  ;;  %vm519_vm6 = vcmask 1041409  }
  0x62   : > { %v359_v28 = vunpack.c.0.s8 %v358_v24  ;;  %vm521_vm7 = vcmask 1042434   ;;  %vm523_vm8 = vcmask 1043459   ;;  %vm525_vm9 = vcmask 1044484  }
  0x63   : > { %v338_v29 = vperm.slane %v1465_v8, %v337_v25  ;;  %v342_v30 = vperm.slane %v334_v21, %v337_v25  ;;  %v348_v31 = vperm.slane %v1467_v11, %v337_v25  ;;  %v352_v32 = vperm.slane %v344_v22, %v337_v25 }
  0x64   : > { %v390_v33 = vperm.slane %v1469_v12, %v337_v25  ;;  %v394_v34 = vperm.slane %v386_v26, %v337_v25  ;;  %v400_v35 = vperm.slane %v1471_v14, %v337_v25  ;;  %v404_v36 = vperm.slane %v396_v27, %v337_v25 }
  0x65   : > { %v353_v37 = vrot.slane %v348_v31, 4  ;;  %v355_v38 = vrot.slane %v338_v29, 4  ;;  %v365_v39 = vrot.slane %v352_v32, 4  ;;  %v367_v40 = vrot.slane %v342_v30, 4 }
  0x66   : > { %v405_v41 = vrot.slane %v400_v35, 4  ;;  %v407_v42 = vrot.slane %v390_v33, 4  ;;  %v417_v43 = vrot.slane %v404_v36, 4  ;;  %v419_v44 = vrot.slane %v394_v34, 4 }
  0x67   : > { %v354_v45 = vsel %vm333_vm4, %v353_v37, %v338_v29  ;;  %v356_v46 = vsel %vm333_vm4, %v348_v31, %v355_v38  ;;  %v366_v47 = vsel %vm333_vm4, %v365_v39, %v342_v30  ;;  %v368_v48 = vsel %vm333_vm4, %v352_v32, %v367_v40 }
  0x68   : > { %v360_v49 = vperm.slane %v354_v45, %v359_v28  ;;  %v364_v50 = vperm.slane %v356_v46, %v359_v28  ;;  %v372_v51 = vperm.slane %v366_v47, %v359_v28  ;;  %v376_v52 = vperm.slane %v368_v48, %v359_v28 }
  0x69   : > { %v406_v53 = vsel %vm333_vm4, %v405_v41, %v390_v33  ;;  %v408_v54 = vsel %vm333_vm4, %v400_v35, %v407_v42  ;;  %v418_v55 = vsel %vm333_vm4, %v417_v43, %v394_v34  ;;  %v420_v56 = vsel %vm333_vm4, %v404_v36, %v419_v44 }
  0x6a   : > { %v377_v57 = vrot.slane %v360_v49, 4  ;;  %v379_v58 = vrot.slane %v364_v50, 4  ;;  %v381_v59 = vrot.slane %v372_v51, 4  ;;  %v383_v60 = vrot.slane %v376_v52, 4 }
  0x6b   : > { %v412_v61 = vperm.slane %v406_v53, %v359_v28  ;;  %v416_v62 = vperm.slane %v408_v54, %v359_v28  ;;  %v424_v63 = vperm.slane %v418_v55, %v359_v28  ;;  %v428_v0 = vperm.slane %v420_v56, %v359_v28 }
  0x6c   : > { %v378_v1 = vsel %vm333_vm4, 0.0, %v377_v57  ;;  %v380_v2 = vsel %vm333_vm4, 0.0, %v379_v58  ;;  %v382_v3 = vsel %vm333_vm4, 0.0, %v381_v59  ;;  %v384_v4 = vsel %vm333_vm4, 0.0, %v383_v60 }
  0x6d   : > { %v429_v5 = vrot.slane %v412_v61, 4  ;;  %v431_v6 = vrot.slane %v416_v62, 4  ;;  %v433_v7 = vrot.slane %v424_v63, 4  ;;  %v435_v9 = vrot.slane %v428_v0, 4 }
  0x6e   : > { %v438_v10 = vsel %vm437_vm5, %v360_v49, 0.0  ;;  %v439_v13 = vsel %vm437_vm5, %v412_v61, 0.0  ;;  %v447_v15 = vsel %vm437_vm5, %v378_v1, 0.0  ;;  %v456_v16 = vsel %vm437_vm5, %v364_v50, 0.0 }
  0x6f   : > { %v430_v17 = vsel %vm333_vm4, 0.0, %v429_v5  ;;  %v432_v18 = vsel %vm333_vm4, 0.0, %v431_v6  ;;  %v434_v19 = vsel %vm333_vm4, 0.0, %v433_v7  ;;  %v436_v20 = vsel %vm333_vm4, 0.0, %v435_v9 }
  0x70   : > { %v440_v21 = vadd.f32 %v439_v13, %v438_v10  ;;  %v448_v22 = vsel %vm437_vm5, %v430_v17, 0.0  ;;  %v457_v23 = vsel %vm437_vm5, %v416_v62, 0.0  ;;  %v465_v24 = vsel %vm437_vm5, %v380_v2, 0.0 }
  0x71   : > { %v449_v25 = vadd.f32 %v448_v22, %v447_v15  ;;  %v458_v26 = vadd.f32 %v457_v23, %v456_v16  ;;  %v466_v27 = vsel %vm437_vm5, %v432_v18, 0.0  ;;  %v474_v28 = vsel %vm437_vm5, %v372_v51, 0.0 }
  0x72   : > { %v441_v29 = vrot.slane %v440_v21, 4  ;;  %v467_v30 = vadd.f32 %v466_v27, %v465_v24  ;;  %v475_v31 = vsel %vm437_vm5, %v424_v63, 0.0  ;;  %v483_v32 = vsel %vm437_vm5, %v382_v3, 0.0 }
  0x73   : > { %v450_v33 = vrot.slane %v449_v25, 4  ;;  %v459_v34 = vrot.slane %v458_v26, 4  ;;  %v476_v35 = vadd.f32 %v475_v31, %v474_v28  ;;  %v484_v36 = vsel %vm437_vm5, %v434_v19, 0.0 }
  0x74   : > { %v442_v37 = vadd.f32 %v441_v29, %v440_v21  ;;  %v468_v38 = vrot.slane %v467_v30, 4  ;;  %v485_v39 = vadd.f32 %v484_v36, %v483_v32  ;;  %v492_v40 = vsel %vm437_vm5, %v376_v52, 0.0 }
  0x75   : > { %v451_v41 = vadd.f32 %v450_v33, %v449_v25  ;;  %v460_v42 = vadd.f32 %v459_v34, %v458_v26  ;;  %v477_v43 = vrot.slane %v476_v35, 4  ;;  %v493_v44 = vsel %vm437_vm5, %v428_v0, 0.0 }
  0x76   : > { %v443_v45 = vrot.slane %v442_v37, 2  ;;  %v469_v46 = vadd.f32 %v468_v38, %v467_v30  ;;  %v486_v47 = vrot.slane %v485_v39, 4  ;;  %v494_v48 = vadd.f32 %v493_v44, %v492_v40 }
  0x77   : > { %v452_v49 = vrot.slane %v451_v41, 2  ;;  %v461_v50 = vrot.slane %v460_v42, 2  ;;  %v478_v51 = vadd.f32 %v477_v43, %v476_v35  ;;  %v501_v53 = vsel %vm437_vm5, %v384_v4, 0.0  ;;  %v510_v35 = vld [vmem:[#allocation2] sm:$0xff] }
  0x78   : > { %v444_v54 = vadd.f32 %v443_v45, %v442_v37  ;;  %v470_v55 = vrot.slane %v469_v46, 2  ;;  %v487_v56 = vadd.f32 %v486_v47, %v485_v39  ;;  %v495_v57 = vrot.slane %v494_v48, 4 }
  0x79   : > { %v453_v52 = vadd.f32 %v452_v49, %v451_v41  ;;  %v462_v58 = vadd.f32 %v461_v50, %v460_v42  ;;  %v479_v59 = vrot.slane %v478_v51, 2  ;;  %v502_v60 = vsel %vm437_vm5, %v436_v20, 0.0 }
  0x7a   : > { %v445_v61 = vrot.slane %v444_v54, 1  ;;  %v471_v62 = vadd.f32 %v470_v55, %v469_v46  ;;  %v488_v63 = vrot.slane %v487_v56, 2  ;;  %v496_v0 = vadd.f32 %v495_v57, %v494_v48 }
  0x7b   : > { %v454_v1 = vrot.slane %v453_v52, 1  ;;  %v463_v2 = vrot.slane %v462_v58, 1  ;;  %v480_v3 = vadd.f32 %v479_v59, %v478_v51  ;;  %v503_v5 = vadd.f32 %v502_v60, %v501_v53 }
  0x7c   : > { %v446_v6 = vadd.f32 %v445_v61, %v444_v54  ;;  %v472_v7 = vrot.slane %v471_v62, 1  ;;  %v489_v4 = vadd.f32 %v488_v63, %v487_v56  ;;  %v497_v9 = vrot.slane %v496_v0, 2 }
  0x7d   : > { %v455_v10 = vadd.f32 %v454_v1, %v453_v52  ;;  %v464_v13 = vadd.f32 %v463_v2, %v462_v58  ;;  %v481_v15 = vrot.slane %v480_v3, 1  ;;  %v504_v16 = vrot.slane %v503_v5, 4 }
  0x7e   : > { %v473_v17 = vadd.f32 %v472_v7, %v471_v62  ;;  %v490_v18 = vrot.slane %v489_v4, 1  ;;  %v498_v19 = vadd.f32 %v497_v9, %v496_v0  ;;  %vm527_vm10 = vcmask 1045509  }
  0x7f   : > { %v482_v20 = vadd.f32 %v481_v15, %v480_v3  ;;  %v505_v21 = vadd.f32 %v504_v16, %v503_v5  ;;  %v520_v22 = vsel %vm519_vm6, %v455_v10, %v446_v6  ;;  %vm529_vm11 = vcmask 1046534  }
  0x80   : > { %v491_v23 = vadd.f32 %v490_v18, %v489_v4  ;;  %v499_v24 = vrot.slane %v498_v19, 1  ;;  %v522_v25 = vsel %vm521_vm7, %v464_v13, %v520_v22  ;;  %vm531_vm12 = vcmask 1047559  }
  0x81   : > { %v506_v26 = vrot.slane %v505_v21, 2  ;;  %v524_v27 = vsel %vm523_vm8, %v473_v17, %v522_v25 }
  0x82   : > { %v500_v28 = vadd.f32 %v499_v24, %v498_v19  ;;  %v526_v29 = vsel %vm525_vm9, %v482_v20, %v524_v27 }
  0x83   : > { %v507_v30 = vadd.f32 %v506_v26, %v505_v21  ;;  %v528_v31 = vsel %vm527_vm10, %v491_v23, %v526_v29 }
  0x84   : > { %v530_v33 = vsel %vm529_vm11, %v500_v28, %v528_v31 }
  0x85   : > { %v508_v32 = vrot.slane %v507_v30, 1 }
  0x87   : > { %v509_v34 = vadd.f32 %v508_v32, %v507_v30 }
  0x89   : > { %v532_v36 = vsel %vm531_vm12, %v509_v34, %v530_v33 }
  0x8a   : > { %v534_v37 = vadd.f32 %v532_v36, %v510_v35 }
  0x8c   : > { %535 = vst [vmem:[#allocation2] sm:$0xff] %v534_v37 }
  0x8d PF: > { %p921_p9 = scmp.le.s32.totalorder %s1437_s6, 60 }
  0x8f   : > { %538 = sbr.rel (%p921_p9) target bundleno = 200 (0xc8), region = 48 }
  0x94   : > { %v539_v38 = vlaneseq  ;;  %v542_v39 = vstv %s919_s28  ;;  %v1256_v40 = vmov 1983009808   ;;  %v1257_v46 = vmov 1934713408  }
  0x95   : > { %v555_v41 = vunpack.c.l.s4 %v1256_v40  ;;  %v577_v47 = vunpack.c.l.s4 %v1257_v46  ;;  %vm552_vm14 = vcmask 1047556   ;;  %vm656_vm0 = vcmask 1041408  }
  0x96   : > { %v540_v42 = vshrl.u32 %v539_v38, 7  ;;  %vm738_vm1 = vcmask 1041409   ;;  %vm740_vm2 = vcmask 1042434   ;;  %vm742_vm3 = vcmask 1043459  }
  0x97   : > { %v556_v45 = vunpack.c.0.s8 %v555_v41  ;;  %v578_v52 = vunpack.c.0.s8 %v577_v47  ;;  %vm744_vm4 = vcmask 1044484   ;;  %vm746_vm5 = vcmask 1045509  }
  0x98   : > { %v541_v43 = vadd.s32 8, %v540_v42  ;;  %v543_v44 = vadd.s32 %v542_v39, %v540_v42  ;;  %vm748_vm6 = vcmask 1046534   ;;  %vm750_vm7 = vcmask 1047559  }
  0x9a   : > { %v544_v48 = vadd.s32 %v542_v39, %v541_v43  ;;  %vm545_vm13 = vcmp.lt.s32.totalorder %v543_v44, 60 }
  0x9b   : > { %v547_v49 = vsel %vm545_vm13, %v1465_v8, 0.0  ;;  %v548_v50 = vsel %vm545_vm13, %v1467_v11, 0.0 }
  0x9c   : > { %vm546_vm15 = vcmp.lt.s32.totalorder %v544_v48, 60  ;;  %v551_v51 = vrot.slane %v547_v49, 4  ;;  %v557_v53 = vperm.slane %v547_v49, %v556_v45  ;;  %v562_v54 = vrot.slane %v548_v50, 4 }
  0x9d   : > { %v549_v55 = vsel %vm546_vm15, %v1469_v12, 0.0  ;;  %v550_v56 = vsel %vm546_vm15, %v1471_v14, 0.0  ;;  %v567_v57 = vperm.slane %v548_v50, %v556_v45 }
  0x9e   : > { %v553_v58 = vsel %vm552_vm14, 0.0, %v551_v51  ;;  %v563_v59 = vsel %vm552_vm14, 0.0, %v562_v54  ;;  %v574_v60 = vrot.slane %v557_v53, 4  ;;  %v604_v8 = vrot.slane %v549_v55, 4 }
  0x9f   : > { %v561_v61 = vperm.slane %v553_v58, %v556_v45  ;;  %v571_v11 = vperm.slane %v563_v59, %v556_v45  ;;  %v572_v62 = vrot.slane %v567_v57, 4  ;;  %v609_v63 = vperm.slane %v549_v55, %v556_v45 }
  0xa0   : > { %v575_v0 = vsel %vm552_vm14, %v567_v57, %v574_v60  ;;  %v605_v1 = vsel %vm552_vm14, 0.0, %v604_v8  ;;  %v614_v2 = vrot.slane %v550_v56, 4  ;;  %v619_v12 = vperm.slane %v550_v56, %v556_v45 }
  0xa1   : > { %v573_v14 = vsel %vm552_vm14, %v572_v62, %v557_v53  ;;  %v583_v3 = vperm.slane %v575_v0, %v578_v52  ;;  %v584_v5 = vrot.slane %v571_v11, 4  ;;  %v586_v6 = vrot.slane %v561_v61, 4 }
  0xa2   : > { %v579_v7 = vperm.slane %v573_v14, %v578_v52  ;;  %v613_v4 = vperm.slane %v605_v1, %v556_v45  ;;  %v615_v9 = vsel %vm552_vm14, 0.0, %v614_v2  ;;  %v624_v10 = vrot.slane %v619_v12, 4 }
  0xa3   : > { %v585_v13 = vsel %vm552_vm14, %v584_v5, %v561_v61  ;;  %v587_v15 = vsel %vm552_vm14, %v571_v11, %v586_v6  ;;  %v598_v16 = vrot.slane %v583_v3, 4  ;;  %v623_v17 = vperm.slane %v615_v9, %v556_v45 }
  0xa4   : > { %v591_v18 = vperm.slane %v585_v13, %v578_v52  ;;  %v595_v19 = vperm.slane %v587_v15, %v578_v52  ;;  %v596_v20 = vrot.slane %v579_v7, 4  ;;  %v625_v21 = vsel %vm552_vm14, %v624_v10, %v609_v63 }
  0xa5   : > { %v599_v22 = vsel %vm552_vm14, 0.0, %v598_v16  ;;  %v626_v23 = vrot.slane %v609_v63, 4  ;;  %v631_v24 = vperm.slane %v625_v21, %v578_v52  ;;  %v636_v25 = vrot.slane %v623_v17, 4 }
  0xa6   : > { %v597_v26 = vsel %vm552_vm14, 0.0, %v596_v20  ;;  %v600_v27 = vrot.slane %v591_v18, 4  ;;  %v602_v28 = vrot.slane %v595_v19, 4  ;;  %v638_v29 = vrot.slane %v613_v4, 4 }
  0xa7   : > { %v627_v30 = vsel %vm552_vm14, %v619_v12, %v626_v23  ;;  %v637_v31 = vsel %vm552_vm14, %v636_v25, %v613_v4  ;;  %v648_v32 = vrot.slane %v631_v24, 4  ;;  %v657_v33 = vsel %vm656_vm0, %v579_v7, 0.0 }
  0xa8   : > { %v601_v34 = vsel %vm552_vm14, 0.0, %v600_v27  ;;  %v603_v35 = vsel %vm552_vm14, 0.0, %v602_v28  ;;  %v635_v36 = vperm.slane %v627_v30, %v578_v52  ;;  %v639_v37 = vsel %vm552_vm14, %v623_v17, %v638_v29 }
  0xa9   : > { %v643_v38 = vperm.slane %v637_v31, %v578_v52  ;;  %v647_v39 = vperm.slane %v639_v37, %v578_v52  ;;  %v649_v40 = vsel %vm552_vm14, 0.0, %v648_v32  ;;  %v658_v41 = vsel %vm656_vm0, %v631_v24, 0.0 }
  0xaa   : > { %v650_v42 = vrot.slane %v635_v36, 4  ;;  %v659_v43 = vadd.f32 %v658_v41, %v657_v33  ;;  %v666_v44 = vsel %vm656_vm0, %v597_v26, 0.0  ;;  %v667_v45 = vsel %vm656_vm0, %v649_v40, 0.0 }
  0xab   : > { %v652_v46 = vrot.slane %v643_v38, 4  ;;  %v654_v47 = vrot.slane %v647_v39, 4  ;;  %v668_v48 = vadd.f32 %v667_v45, %v666_v44  ;;  %v675_v49 = vsel %vm656_vm0, %v583_v3, 0.0 }
  0xac   : > { %v651_v50 = vsel %vm552_vm14, 0.0, %v650_v42  ;;  %v660_v51 = vrot.slane %v659_v43, 4  ;;  %v676_v53 = vsel %vm656_vm0, %v635_v36, 0.0  ;;  %v684_v54 = vsel %vm656_vm0, %v599_v22, 0.0 }
  0xad   : > { %v653_v55 = vsel %vm552_vm14, 0.0, %v652_v46  ;;  %v655_v56 = vsel %vm552_vm14, 0.0, %v654_v47  ;;  %v669_v57 = vrot.slane %v668_v48, 4  ;;  %v677_v52 = vadd.f32 %v676_v53, %v675_v49 }
  0xae   : > { %v661_v58 = vadd.f32 %v660_v51, %v659_v43  ;;  %v685_v59 = vsel %vm656_vm0, %v651_v50, 0.0  ;;  %v693_v60 = vsel %vm656_vm0, %v591_v18, 0.0  ;;  %v694_v8 = vsel %vm656_vm0, %v643_v38, 0.0 }
  0xaf   : > { %v670_v61 = vadd.f32 %v669_v57, %v668_v48  ;;  %v678_v11 = vrot.slane %v677_v52, 4  ;;  %v686_v62 = vadd.f32 %v685_v59, %v684_v54  ;;  %v695_v63 = vadd.f32 %v694_v8, %v693_v60  ;;  %v729_v59 = vld [vmem:[#allocation2] sm:$0xff] }
  0xb0   : > { %v662_v0 = vrot.slane %v661_v58, 2  ;;  %v702_v1 = vsel %vm656_vm0, %v601_v34, 0.0  ;;  %v703_v2 = vsel %vm656_vm0, %v653_v55, 0.0  ;;  %v711_v12 = vsel %vm656_vm0, %v595_v19, 0.0 }
  0xb1   : > { %v671_v14 = vrot.slane %v670_v61, 2  ;;  %v679_v3 = vadd.f32 %v678_v11, %v677_v52  ;;  %v687_v5 = vrot.slane %v686_v62, 4  ;;  %v696_v6 = vrot.slane %v695_v63, 4 }
  0xb2   : > { %v663_v7 = vadd.f32 %v662_v0, %v661_v58  ;;  %v704_v4 = vadd.f32 %v703_v2, %v702_v1  ;;  %v712_v9 = vsel %vm656_vm0, %v647_v39, 0.0  ;;  %v720_v10 = vsel %vm656_vm0, %v603_v35, 0.0 }
  0xb3   : > { %v672_v13 = vadd.f32 %v671_v14, %v670_v61  ;;  %v680_v15 = vrot.slane %v679_v3, 2  ;;  %v688_v16 = vadd.f32 %v687_v5, %v686_v62  ;;  %v697_v17 = vadd.f32 %v696_v6, %v695_v63 }
  0xb4   : > { %v664_v18 = vrot.slane %v663_v7, 1  ;;  %v705_v20 = vrot.slane %v704_v4, 4  ;;  %v713_v21 = vadd.f32 %v712_v9, %v711_v12  ;;  %v721_v22 = vsel %vm656_vm0, %v655_v56, 0.0 }
  0xb5   : > { %v673_v19 = vrot.slane %v672_v13, 1  ;;  %v681_v23 = vadd.f32 %v680_v15, %v679_v3  ;;  %v689_v24 = vrot.slane %v688_v16, 2  ;;  %v698_v25 = vrot.slane %v697_v17, 2 }
  0xb6   : > { %v665_v26 = vadd.f32 %v664_v18, %v663_v7  ;;  %v706_v27 = vadd.f32 %v705_v20, %v704_v4  ;;  %v714_v28 = vrot.slane %v713_v21, 4  ;;  %v722_v29 = vadd.f32 %v721_v22, %v720_v10 }
  0xb7   : > { %v674_v30 = vadd.f32 %v673_v19, %v672_v13  ;;  %v682_v31 = vrot.slane %v681_v23, 1  ;;  %v690_v32 = vadd.f32 %v689_v24, %v688_v16  ;;  %v699_v33 = vadd.f32 %v698_v25, %v697_v17 }
  0xb8   : > { %v707_v34 = vrot.slane %v706_v27, 2  ;;  %v715_v35 = vadd.f32 %v714_v28, %v713_v21  ;;  %v723_v36 = vrot.slane %v722_v29, 4 }
  0xb9   : > { %v683_v37 = vadd.f32 %v682_v31, %v681_v23  ;;  %v691_v38 = vrot.slane %v690_v32, 1  ;;  %v700_v39 = vrot.slane %v699_v33, 1  ;;  %v739_v40 = vsel %vm738_vm1, %v674_v30, %v665_v26 }
  0xba   : > { %v708_v41 = vadd.f32 %v707_v34, %v706_v27  ;;  %v716_v42 = vrot.slane %v715_v35, 2  ;;  %v724_v43 = vadd.f32 %v723_v36, %v722_v29 }
  0xbb   : > { %v692_v44 = vadd.f32 %v691_v38, %v690_v32  ;;  %v701_v45 = vadd.f32 %v700_v39, %v699_v33  ;;  %v741_v46 = vsel %vm740_vm2, %v683_v37, %v739_v40 }
  0xbc   : > { %v709_v47 = vrot.slane %v708_v41, 1  ;;  %v717_v48 = vadd.f32 %v716_v42, %v715_v35  ;;  %v725_v49 = vrot.slane %v724_v43, 2 }
  0xbd   : > { %v743_v50 = vsel %vm742_vm3, %v692_v44, %v741_v46 }
  0xbe   : > { %v710_v51 = vadd.f32 %v709_v47, %v708_v41  ;;  %v718_v53 = vrot.slane %v717_v48, 1  ;;  %v726_v54 = vadd.f32 %v725_v49, %v724_v43  ;;  %v745_v55 = vsel %vm744_vm4, %v701_v45, %v743_v50 }
  0xc0   : > { %v719_v56 = vadd.f32 %v718_v53, %v717_v48  ;;  %v727_v57 = vrot.slane %v726_v54, 1  ;;  %v747_v52 = vsel %vm746_vm5, %v710_v51, %v745_v55 }
  0xc2   : > { %v728_v58 = vadd.f32 %v727_v57, %v726_v54  ;;  %v749_v60 = vsel %vm748_vm6, %v719_v56, %v747_v52 }
  0xc4   : > { %v751_v8 = vsel %vm750_vm7, %v728_v58, %v749_v60 }
  0xc5   : > { %v753_v61 = vadd.f32 %v751_v8, %v729_v59 }
  0xc7   : > { %754 = vst [vmem:[#allocation2] sm:$0xff] %v753_v61 }
  0xc8 PF: > { %p922_p10 = scmp.ne.s32.totalorder %s1233_s15, 1 }
  0xca   : > { %758 = sbr.rel (%p922_p10) target bundleno = 388 (0x184), region = 52 }
  0xcf   : > { %v759_v11 = vld [vmem:[#allocation2] sm:$0xff] }
  0xd0   : > { %760 = vadd.xlane.f32.xlu0 %v759_v11 }
 0x143   : > { %v761_v62 = vpop.xlane.xlu0 %760 }
 0x144   : > { %v762_v63 = vrot.slane %v761_v62, 4 }
 0x146   : > { %v763_v0 = vadd.f32 %v762_v63, %v761_v62 }
 0x148   : > { %v764_v1 = vrot.slane %v763_v0, 2 }
 0x14a   : > { %v765_v2 = vadd.f32 %v764_v1, %v763_v0 }
 0x14c   : > { %v766_v12 = vrot.slane %v765_v2, 1 }
 0x14e   : > { %v767_v14 = vadd.f32 %v766_v12, %v765_v2 }
 0x150   : > { %931 = vpush %v767_v14 }
 0x181   : > { %s932_s7 = spop %931 }
 0x182   : > { %v769_v3 = vstv %s932_s7 }
 0x183   : > { %770 = vst [vmem:[%s231_s18] sm:$0xff] %v769_v3 }
 0x184 PF: > { %s924_s15 = sshll.u32 %s1237_s16, 3  ;;  %s784_s25 = sshll.u32 %s231_s18, 4  ;;  %s785_s25 = int_to_ptr.vmem [resolvable:$true] %s784_s25 }
 0x185   : > { %s782_s21 = scalar_lea.hbm %s1623_s2, %s924_s15  ;;  %s772_s30 = scalar_lea.sflag [#allocation5], %s229_s0 }
 0x186   : > { %s786_s29 = sshll.u32 %s782_s21, 4  ;;  %s1143_s23 = scalar_lea.hbm %s1623_s2, 16  ;;  %s787_s29 = int_to_ptr.hbm [resolvable:$true] %s786_s29 }
 0x187   : > { %s1137_s3 = sshra.s32 %s787_s29, 4  ;;  %s1138_s3 = int_to_ptr.hbm [resolvable:$true] %s1137_s3 }
 0x188   : > { %s1139_s5 = scalar_lea.hbm %s1138_s3, 8  ;;  %p1144_p1 = scmp.lt.s32.totalorder %s1138_s3, %s1623_s2 }
 0x189   : > { %p1140_p11 = scmp.ne.s32.totalorder %s1138_s3, %s1139_s5  ;;  %p1145_p3 = scmp.lt.s32.totalorder %s1143_s23, %s1139_s5 }
 0x18b   : > { %p1141_p13 = pnand %p1140_p11, %p1366_p12  ;;  %p1146_p4 = por %p1145_p3, %p1144_p1 }
 0x18d   : > { %p1142_p0 = pneg %p1141_p13 }
 0x18f   : > { %p1147_p6 = pnand %p1146_p4, %p1142_p0 }
 0x191   : > { %1150 = shalt.err (!%p1147_p6)
}
 0x192   : > { %937 = dma.vmem_to_hbm [thread:$0]  (%p1366_p12), %s785_s25, 128, %s787_s29, %s772_s30  }
 0x193 PF: > { %p951_p8 = scmp.ge.s32.totalorder %s1249_s19, 2  ;;  %s798_s0 = sand.u32 1, %s1209_s9  }
 0x194   : > { %s799_s17 = scalar_lea.sflag [#allocation5], %s798_s0 }
 0x195   : > { %p947_p5 = pnand %p951_p8, %p1378_p2 }
 0x197   : > { %p948_p7 = pneg %p947_p5 }
 0x199   : > { %1204 = dma.done.wait (%p948_p7), %s799_s17, 128  }
 0x19a   : > { %1206 = vsyncadd (%p948_p7), %s799_s17, 4294967168  ;;  %s21_s19 = sadd.s32 1, %s1249_s19   ;;  %s1647_s18 = sld [smem:[#allocation17_spill]] }
 0x19b   : > { %p18_p9 = scmp.ge.s32.totalorder %s21_s19, 6   ;;  %s1648_s8 = sld [smem:[#allocation12_spill]] }
 0x19c   : > { %s1649_s14 = sld [smem:[#allocation18_spill]]  ;;  %s1654_s9 = smov %s1213_s10 }
 0x19d   : > { %s1650_s15 = sld [smem:[#allocation13_spill]]  ;;  %s1655_s10 = smov %s1217_s11 }
 0x19e   : > { %s1651_s16 = sld [smem:[#allocation14_spill]]  ;;  %s1657_s12 = smov %s1225_s13 }
 0x19f   : > { %s1652_s17 = sld [smem:[#allocation15_spill]] }
 0x1a0   : > { %s1653_s22 = sld [smem:[#allocation16_spill]]  ;;  %s1656_s11 = smov %s1647_s18 }
 0x1a1   : > { %s1658_s13 = smov %s1648_s8 }
 0x1a2   :  { %20 = sbr.rel (!%p18_p9) target bundleno = 13 (0xd), region = 102 }
 0x1a6   : > { %s1659_s18 = smov %s1653_s22 }
 0x1a7   :  { %805 = vsyncpa [#allocation4], 1 }
 0x1a8   :  { %807 = vsyncpa [#allocation4 + $0x1], 1 }
 0x1a9   :  { %808 = vsyncpa [#allocation7], 1 }
 0x1aa   :  { %810 = vsyncpa [#allocation7 + $0x1], 1 }
 0x1ab   :  { %811 = vsyncpa [#allocation5], 1 }
 0x1ac   :  { %813 = vsyncpa [#allocation5 + $0x1], 1 }

</bundles_post_ra>
